<compile_context>
chip_gen: v7x
topology: tpu7x:2x2x1
jax: 0.10.0
libtpu: 0.0.40
codegen_flags: <defaults>
</compile_context>

<pallas_src>
import jax
import jax.numpy as jnp
from jax.experimental import pallas as pl
from jax.experimental.pallas import tpu as pltpu

LANE = 128  # last-dim multiple needed for dense (unmasked) vector stores


def _round_up(n, m):
    return ((n + m - 1) // m) * m


def decoder_kernel(x_ref, w1_ref, b1_ref, w2_ref, b2_ref, o_ref, acc_ref):
    k = pl.program_id(1)  # dim_forward tile index (reduction axis, last in grid)

    @pl.when(k == 0)
    def _init():
        acc_ref[...] = jnp.zeros_like(acc_ref)

    # linear1 on this Dff tile: cast x to bf16 in-kernel (cast hides under MXU work),
    # accumulate in f32 on the MXU.
    h = jnp.dot(x_ref[...].astype(jnp.bfloat16), w1_ref[...],
                preferred_element_type=jnp.float32)
    # bias + ReLU in f32 on the VPU (v5e has no bf16 VALU); fold the bf16 cast for the
    # second matmul into the same pass over h so it is materialized only once.
    h = jnp.maximum(h + b1_ref[...], 0.0).astype(jnp.bfloat16)
    # TODO(synk): Dropout is identity in eval mode; training-mode dropout
    # (pltpu.prng_seed + prng_random_bits mask + 1/(1-p) scale) is not emitted.
    # linear2 partial product for this Dff tile, accumulated in f32.
    acc_ref[...] += jnp.dot(h, w2_ref[...], preferred_element_type=jnp.float32)

    @pl.when(k == pl.num_programs(1) - 1)
    def _finalize():
        o_ref[...] = (acc_ref[...] + b2_ref[...]).astype(o_ref.dtype)


def prepare_decoder_params(w1, b1, w2, b2, *, ff_block=2048):
    """One-time weight preparation (do this at parameter-init time, not per forward call).

    w1: [Din, Dff], b1: [Dff] or [1, Dff], w2: [Dff, Dout], b2: [Dout] or [1, Dout].
    Weights are cast to bf16 and zero-padded so the output lane axis is a multiple of 128
    and (for large Dff) the Dff axis is a multiple of the ff tile. Zero-padded Dff columns
    produce relu(0) = 0 and contribute nothing to the second matmul, so padding is exact.
    """
    din, dff = w1.shape
    dout = w2.shape[1]
    dout_p = _round_up(dout, LANE)
    if dff <= ff_block:
        tff, dff_p = dff, dff                 # single Dff tile, weights stay resident
    else:
        tff = _round_up(ff_block, LANE)       # stream Dff in lane-aligned tiles
        dff_p = _round_up(dff, tff)

    b1 = jnp.asarray(b1).reshape(1, dff).astype(jnp.float32)
    b2 = jnp.asarray(b2).reshape(1, dout).astype(jnp.float32)
    return dict(
        w1=jnp.pad(w1.astype(jnp.bfloat16), ((0, 0), (0, dff_p - dff))),
        b1=jnp.pad(b1, ((0, 0), (0, dff_p - dff))),
        w2=jnp.pad(w2.astype(jnp.bfloat16), ((0, dff_p - dff), (0, dout_p - dout))),
        b2=jnp.pad(b2, ((0, 0), (0, dout_p - dout))),
        din=din, dff_p=dff_p, tff=tff, dout=dout, dout_p=dout_p,
    )


def _vmem_estimate(block_m, din, tff, dout_p, kff):
    f32, bf16 = 4, 2
    x_tile = 2 * block_m * din * f32            # double-buffered f32 x tile
    out_tile = 2 * block_m * dout_p * f32       # double-buffered output tile
    wbuf = 2 if kff > 1 else 1                  # weights stream (2 bufs) or stay resident (1)
    w1 = wbuf * din * tff * bf16
    b1 = wbuf * tff * f32
    w2 = wbuf * tff * dout_p * bf16
    b2 = dout_p * f32
    acc = block_m * dout_p * f32                # accumulator scratch
    h = block_m * tff * f32                     # linear1 intermediate
    return x_tile + out_tile + w1 + b1 + w2 + b2 + acc + h


def decoder_forward(x, params, *, block_m=None, out_dtype=jnp.float32,
                    vmem_budget_bytes=40 * 2**20):
    """x: [batch, Din] (f32 or bf16); params from prepare_decoder_params()."""
    batch, din = x.shape
    assert din == params["din"], "x feature dim does not match prepared weights"
    dff_p, tff = params["dff_p"], params["tff"]
    dout, dout_p = params["dout"], params["dout_p"]
    kff = dff_p // tff

    # Tile selection: large rows-per-step for HBM roofline (sweep 256/512/1024 for real
    # batches), but never pad a small batch up to the tile size. Shrink until the VMEM
    # footprint fits the budget (matters on v7x: 64 MiB physical, 32 MiB default scoped).
    if block_m is None:
        block_m = 512
    block_m = max(8, _round_up(min(block_m, _round_up(batch, 8)), 8))
    while block_m > 8 and _vmem_estimate(block_m, din, tff, dout_p, kff) > vmem_budget_bytes:
        block_m //= 2
        block_m = max(8, _round_up(block_m, 8))

    batch_p = _round_up(batch, block_m)
    x_p = jnp.pad(x, ((0, batch_p - batch), (0, 0))) if batch_p != batch else x

    grid = (batch_p // block_m, kff)
    est = _vmem_estimate(block_m, din, tff, dout_p, kff)
    vmem_limit = int(min(max(2 * est, 32 * 2**20), 56 * 2**20))

    def build(single_buffer_const):
        def spec(shape, index_map, *, single=False):
            if single and single_buffer_const:
                # Constant block index -> one VMEM buffer is enough (halves weight footprint).
                return pl.BlockSpec(shape, index_map, pipeline_mode=pl.Buffered(1))
            return pl.BlockSpec(shape, index_map)

        const_w = (kff == 1)  # weight/bias blocks never change when there is a single Dff tile
        return pl.pallas_call(
            decoder_kernel,
            out_shape=jax.ShapeDtypeStruct((batch_p, dout_p), out_dtype),
            grid_spec=pltpu.PrefetchScalarGridSpec(
                num_scalar_prefetch=0,
                grid=grid,
                in_specs=[
                    spec((block_m, din), lambda i, k: (i, 0)),              # x row slab
                    spec((din, tff), lambda i, k: (0, k), single=const_w),  # W1 column tile
                    spec((1, tff), lambda i, k: (0, k), single=const_w),    # b1 tile
                    spec((tff, dout_p), lambda i, k: (k, 0), single=const_w),  # W2 row tile
                    spec((1, dout_p), lambda i, k: (0, 0), single=True),    # b2 (always const)
                ],
                out_specs=pl.BlockSpec((block_m, dout_p), lambda i, k: (i, 0)),
                scratch_shapes=[pltpu.VMEM((block_m, dout_p), jnp.float32)],
            ),
            compiler_params=pltpu.CompilerParams(
                dimension_semantics=("parallel", "arbitrary"),
                vmem_limit_bytes=vmem_limit,
            ),
        )

    args = (x_p, params["w1"], params["b1"], params["w2"], params["b2"])
    try:
        out_p = build(True)(*args)
    except Exception:
        # Fallback for JAX versions where BlockSpec(pipeline_mode=pl.Buffered(1)) is unsupported.
        out_p = build(False)(*args)

    if batch_p != batch or dout_p != dout:
        out_p = out_p[:batch, :dout]
    return out_p


def init_linear(key, fan_in, fan_out, dtype=jnp.float32):
    # Deterministic PyTorch-style init: U(-1/sqrt(fan_in), 1/sqrt(fan_in))
    kw, kb = jax.random.split(key)
    bound = 1.0 / (fan_in ** 0.5)
    w = jax.random.uniform(kw, (fan_in, fan_out), dtype, minval=-bound, maxval=bound)
    b = jax.random.uniform(kb, (1, fan_out), dtype, minval=-bound, maxval=bound)
    return w, b


if __name__ == "__main__":
    dim_input, dim_forward, dim_output = 32, 64, 16
    batch = 8

    key = jax.random.PRNGKey(0)
    kx, k1, k2 = jax.random.split(key, 3)

    x = jax.random.normal(kx, (batch, dim_input), jnp.float32)
    w1, b1 = init_linear(k1, dim_input, dim_forward)
    w2, b2 = init_linear(k2, dim_forward, dim_output)

    # One-time weight prep (pad + bf16 cast) outside the forward path.
    params = prepare_decoder_params(w1, b1, w2, b2)

    out = decoder_forward(x, params)
    jax.block_until_ready(out)
    assert out.shape == (batch, dim_output)

    # Reference 1: exact bf16-cast semantics (matches the kernel's dtypes).
    xb, w1b, w2b = x.astype(jnp.bfloat16), w1.astype(jnp.bfloat16), w2.astype(jnp.bfloat16)
    h_ref = jnp.maximum(jnp.dot(xb, w1b, preferred_element_type=jnp.float32) + b1, 0.0)
    ref_bf16 = jnp.dot(h_ref.astype(jnp.bfloat16), w2b, preferred_element_type=jnp.float32) + b2
    assert jnp.allclose(out, ref_bf16, atol=1e-3, rtol=1e-3)

    # Reference 2: full-f32 PyTorch-equivalent forward (loose tolerance due to bf16 MXU inputs).
    ref_f32 = jnp.maximum(x @ w1 + b1, 0.0) @ w2 + b2
    assert jnp.allclose(out, ref_f32, atol=5e-2, rtol=5e-2)

    print("KERNEL_OK")
</pallas_src>

<mosaic_0001>
module attributes {stable_mosaic.version = 11 : i64} {
  func.func @decoder_kernel(%arg0: i32, %arg1: i32, %arg2: memref<8x32xf32, #tpu.memory_space<vmem>>, %arg3: memref<32x64xbf16, #tpu.memory_space<vmem>>, %arg4: memref<1x64xf32, #tpu.memory_space<vmem>>, %arg5: memref<64x128xbf16, #tpu.memory_space<vmem>>, %arg6: memref<1x128xf32, #tpu.memory_space<vmem>>, %arg7: memref<8x128xf32, #tpu.memory_space<vmem>>, %arg8: memref<8x128xf32, #tpu.memory_space<vmem>>) attributes {dimension_semantics = [#tpu.dimension_semantics<parallel>, #tpu.dimension_semantics<arbitrary>], iteration_bounds = array<i64: 1, 1>, scalar_prefetch = 0 : i64, scratch_operands = 1 : i64, tpu.core_type = #tpu.core_type<tc>, window_params = [{transform_indices = @transform_0, window_bounds = array<i64: 8, 32>}, {pipeline_mode = #tpu.pipeline_mode<synchronous>, transform_indices = @transform_1, window_bounds = array<i64: 32, 64>}, {pipeline_mode = #tpu.pipeline_mode<synchronous>, transform_indices = @transform_2, window_bounds = array<i64: 1, 64>}, {pipeline_mode = #tpu.pipeline_mode<synchronous>, transform_indices = @transform_3, window_bounds = array<i64: 64, 128>}, {pipeline_mode = #tpu.pipeline_mode<synchronous>, transform_indices = @transform_4, window_bounds = array<i64: 1, 128>}, {transform_indices = @transform_5, window_bounds = array<i64: 8, 128>}]} {
    %c0_i32 = arith.constant 0 : i32
    %0 = arith.cmpi eq, %arg1, %c0_i32 : i32
    %1 = arith.extui %0 : i1 to i32
    %c0_i32_0 = arith.constant 0 : i32
    %2 = arith.cmpi ne, %1, %c0_i32_0 : i32
    scf.if %2 {
      %cst_16 = arith.constant 0.000000e+00 : f32
      %21 = vector.broadcast %cst_16 : f32 to vector<8x128xf32>
      %c0_17 = arith.constant 0 : index
      %c0_18 = arith.constant 0 : index
      %22 = vector.load %arg8[%c0_17, %c0_18] : memref<8x128xf32, #tpu.memory_space<vmem>>, vector<8x128xf32>
      tpu.vector_store %arg8[%c0_17, %c0_18], %21 {strides = array<i32>} : memref<8x128xf32, #tpu.memory_space<vmem>>, vector<8x128xf32>,
    } else {
    }
    %c0 = arith.constant 0 : index
    %c0_1 = arith.constant 0 : index
    %3 = vector.load %arg2[%c0, %c0_1] : memref<8x32xf32, #tpu.memory_space<vmem>>, vector<8x32xf32>
    %4 = arith.truncf %3 : vector<8x32xf32> to vector<8x32xbf16>
    %c0_2 = arith.constant 0 : index
    %c0_3 = arith.constant 0 : index
    %5 = vector.load %arg3[%c0_2, %c0_3] : memref<32x64xbf16, #tpu.memory_space<vmem>>, vector<32x64xbf16>
    %cst = arith.constant dense<0.000000e+00> : vector<8x64xf32>
    %6 = tpu.matmul %4, %5, %cst {dimension_numbers = #tpu.dot_dimension_numbers<[1], [0], [0], [1], [0, 0, 1, 1], [], []>} : vector<8x32xbf16>, vector<32x64xbf16>, vector<8x64xf32> -> vector<8x64xf32>
    %c0_4 = arith.constant 0 : index
    %c0_5 = arith.constant 0 : index
    %7 = vector.load %arg4[%c0_4, %c0_5] : memref<1x64xf32, #tpu.memory_space<vmem>>, vector<1x64xf32>
    %8 = vector.broadcast %7 : vector<1x64xf32> to vector<8x64xf32>
    %9 = arith.addf %6, %8 : vector<8x64xf32>
    %cst_6 = arith.constant 0.000000e+00 : f32
    %10 = vector.broadcast %cst_6 : f32 to vector<8x64xf32>
    %11 = arith.maximumf %9, %10 : vector<8x64xf32>
    %12 = arith.truncf %11 : vector<8x64xf32> to vector<8x64xbf16>
    %c0_7 = arith.constant 0 : index
    %c0_8 = arith.constant 0 : index
    %13 = vector.load %arg8[%c0_7, %c0_8] : memref<8x128xf32, #tpu.memory_space<vmem>>, vector<8x128xf32>
    %c0_9 = arith.constant 0 : index
    %c0_10 = arith.constant 0 : index
    %14 = vector.load %arg5[%c0_9, %c0_10] : memref<64x128xbf16, #tpu.memory_space<vmem>>, vector<64x128xbf16>
    %cst_11 = arith.constant dense<0.000000e+00> : vector<8x128xf32>
    %15 = tpu.matmul %12, %14, %cst_11 {dimension_numbers = #tpu.dot_dimension_numbers<[1], [0], [0], [1], [0, 0, 1, 1], [], []>} : vector<8x64xbf16>, vector<64x128xbf16>, vector<8x128xf32> -> vector<8x128xf32>
    %16 = arith.addf %13, %15 : vector<8x128xf32>
    %c0_12 = arith.constant 0 : index
    %c0_13 = arith.constant 0 : index
    %17 = vector.load %arg8[%c0_12, %c0_13] : memref<8x128xf32, #tpu.memory_space<vmem>>, vector<8x128xf32>
    tpu.vector_store %arg8[%c0_12, %c0_13], %16 {strides = array<i32>} : memref<8x128xf32, #tpu.memory_space<vmem>>, vector<8x128xf32>,
    %c0_i32_14 = arith.constant 0 : i32
    %18 = arith.cmpi eq, %arg1, %c0_i32_14 : i32
    %19 = arith.extui %18 : i1 to i32
    %c0_i32_15 = arith.constant 0 : i32
    %20 = arith.cmpi ne, %19, %c0_i32_15 : i32
    scf.if %20 {
      %c0_16 = arith.constant 0 : index
      %c0_17 = arith.constant 0 : index
      %21 = vector.load %arg8[%c0_16, %c0_17] : memref<8x128xf32, #tpu.memory_space<vmem>>, vector<8x128xf32>
      %c0_18 = arith.constant 0 : index
      %c0_19 = arith.constant 0 : index
      %22 = vector.load %arg6[%c0_18, %c0_19] : memref<1x128xf32, #tpu.memory_space<vmem>>, vector<1x128xf32>
      %23 = vector.broadcast %22 : vector<1x128xf32> to vector<8x128xf32>
      %24 = arith.addf %21, %23 : vector<8x128xf32>
      %c0_20 = arith.constant 0 : index
      %c0_21 = arith.constant 0 : index
      %25 = vector.load %arg7[%c0_20, %c0_21] : memref<8x128xf32, #tpu.memory_space<vmem>>, vector<8x128xf32>
      tpu.vector_store %arg7[%c0_20, %c0_21], %24 {strides = array<i32>} : memref<8x128xf32, #tpu.memory_space<vmem>>, vector<8x128xf32>,
    } else {
    }
    return
  }
  func.func @transform_0(%arg0: i32, %arg1: i32) -> (i32, i32) {
    %c0_i32 = arith.constant 0 : i32
    %c0_i32_0 = arith.constant 0 : i32
    return %arg0, %c0_i32 : i32, i32
  }
  func.func @transform_1(%arg0: i32, %arg1: i32) -> (i32, i32) {
    %c0_i32 = arith.constant 0 : i32
    %c0_i32_0 = arith.constant 0 : i32
    return %c0_i32, %arg1 : i32, i32
  }
  func.func @transform_2(%arg0: i32, %arg1: i32) -> (i32, i32) {
    %c0_i32 = arith.constant 0 : i32
    %c0_i32_0 = arith.constant 0 : i32
    return %c0_i32, %arg1 : i32, i32
  }
  func.func @transform_3(%arg0: i32, %arg1: i32) -> (i32, i32) {
    %c0_i32 = arith.constant 0 : i32
    %c0_i32_0 = arith.constant 0 : i32
    return %arg1, %c0_i32 : i32, i32
  }
  func.func @transform_4(%arg0: i32, %arg1: i32) -> (i32, i32) {
    %c0_i32 = arith.constant 0 : i32
    %c0_i32_0 = arith.constant 0 : i32
    %c0_i32_1 = arith.constant 0 : i32
    return %c0_i32, %c0_i32_0 : i32, i32
  }
  func.func @transform_5(%arg0: i32, %arg1: i32) -> (i32, i32) {
    %c0_i32 = arith.constant 0 : i32
    %c0_i32_0 = arith.constant 0 : i32
    return %arg0, %c0_i32 : i32, i32
  }
}

module attributes {stable_mosaic.version = 11 : i64} {
  func.func @decoder_kernel(%arg0: i32, %arg1: i32, %arg2: memref<8x32xf32, #tpu.memory_space<vmem>>, %arg3: memref<32x64xbf16, #tpu.memory_space<vmem>>, %arg4: memref<1x64xf32, #tpu.memory_space<vmem>>, %arg5: memref<64x128xbf16, #tpu.memory_space<vmem>>, %arg6: memref<1x128xf32, #tpu.memory_space<vmem>>, %arg7: memref<8x128xf32, #tpu.memory_space<vmem>>, %arg8: memref<8x128xf32, #tpu.memory_space<vmem>>) attributes {dimension_semantics = [#tpu.dimension_semantics<parallel>, #tpu.dimension_semantics<arbitrary>], iteration_bounds = array<i64: 1, 1>, scalar_prefetch = 0 : i64, scratch_operands = 1 : i64, tpu.core_type = #tpu.core_type<tc>, window_params = [{transform_indices = @transform_0, window_bounds = array<i64: 8, 32>}, {transform_indices = @transform_1, window_bounds = array<i64: 32, 64>}, {transform_indices = @transform_2, window_bounds = array<i64: 1, 64>}, {transform_indices = @transform_3, window_bounds = array<i64: 64, 128>}, {pipeline_mode = #tpu.pipeline_mode<synchronous>, transform_indices = @transform_4, window_bounds = array<i64: 1, 128>}, {transform_indices = @transform_5, window_bounds = array<i64: 8, 128>}]} {
    %c0_i32 = arith.constant 0 : i32
    %0 = arith.cmpi eq, %arg1, %c0_i32 : i32
    %1 = arith.extui %0 : i1 to i32
    %c0_i32_0 = arith.constant 0 : i32
    %2 = arith.cmpi ne, %1, %c0_i32_0 : i32
    scf.if %2 {
      %cst_16 = arith.constant 0.000000e+00 : f32
      %21 = vector.broadcast %cst_16 : f32 to vector<8x128xf32>
      %c0_17 = arith.constant 0 : index
      %c0_18 = arith.constant 0 : index
      %22 = vector.load %arg8[%c0_17, %c0_18] : memref<8x128xf32, #tpu.memory_space<vmem>>, vector<8x128xf32>
      tpu.vector_store %arg8[%c0_17, %c0_18], %21 {strides = array<i32>} : memref<8x128xf32, #tpu.memory_space<vmem>>, vector<8x128xf32>,
    } else {
    }
    %c0 = arith.constant 0 : index
    %c0_1 = arith.constant 0 : index
    %3 = vector.load %arg2[%c0, %c0_1] : memref<8x32xf32, #tpu.memory_space<vmem>>, vector<8x32xf32>
    %4 = arith.truncf %3 : vector<8x32xf32> to vector<8x32xbf16>
    %c0_2 = arith.constant 0 : index
    %c0_3 = arith.constant 0 : index
    %5 = vector.load %arg3[%c0_2, %c0_3] : memref<32x64xbf16, #tpu.memory_space<vmem>>, vector<32x64xbf16>
    %cst = arith.constant dense<0.000000e+00> : vector<8x64xf32>
    %6 = tpu.matmul %4, %5, %cst {dimension_numbers = #tpu.dot_dimension_numbers<[1], [0], [0], [1], [0, 0, 1, 1], [], []>} : vector<8x32xbf16>, vector<32x64xbf16>, vector<8x64xf32> -> vector<8x64xf32>
    %c0_4 = arith.constant 0 : index
    %c0_5 = arith.constant 0 : index
    %7 = vector.load %arg4[%c0_4, %c0_5] : memref<1x64xf32, #tpu.memory_space<vmem>>, vector<1x64xf32>
    %8 = vector.broadcast %7 : vector<1x64xf32> to vector<8x64xf32>
    %9 = arith.addf %6, %8 : vector<8x64xf32>
    %cst_6 = arith.constant 0.000000e+00 : f32
    %10 = vector.broadcast %cst_6 : f32 to vector<8x64xf32>
    %11 = arith.maximumf %9, %10 : vector<8x64xf32>
    %12 = arith.truncf %11 : vector<8x64xf32> to vector<8x64xbf16>
    %c0_7 = arith.constant 0 : index
    %c0_8 = arith.constant 0 : index
    %13 = vector.load %arg8[%c0_7, %c0_8] : memref<8x128xf32, #tpu.memory_space<vmem>>, vector<8x128xf32>
    %c0_9 = arith.constant 0 : index
    %c0_10 = arith.constant 0 : index
    %14 = vector.load %arg5[%c0_9, %c0_10] : memref<64x128xbf16, #tpu.memory_space<vmem>>, vector<64x128xbf16>
    %cst_11 = arith.constant dense<0.000000e+00> : vector<8x128xf32>
    %15 = tpu.matmul %12, %14, %cst_11 {dimension_numbers = #tpu.dot_dimension_numbers<[1], [0], [0], [1], [0, 0, 1, 1], [], []>} : vector<8x64xbf16>, vector<64x128xbf16>, vector<8x128xf32> -> vector<8x128xf32>
    %16 = arith.addf %13, %15 : vector<8x128xf32>
    %c0_12 = arith.constant 0 : index
    %c0_13 = arith.constant 0 : index
    %17 = vector.load %arg8[%c0_12, %c0_13] : memref<8x128xf32, #tpu.memory_space<vmem>>, vector<8x128xf32>
    tpu.vector_store %arg8[%c0_12, %c0_13], %16 {strides = array<i32>} : memref<8x128xf32, #tpu.memory_space<vmem>>, vector<8x128xf32>,
    %c0_i32_14 = arith.constant 0 : i32
    %18 = arith.cmpi eq, %arg1, %c0_i32_14 : i32
    %19 = arith.extui %18 : i1 to i32
    %c0_i32_15 = arith.constant 0 : i32
    %20 = arith.cmpi ne, %19, %c0_i32_15 : i32
    scf.if %20 {
      %c0_16 = arith.constant 0 : index
      %c0_17 = arith.constant 0 : index
      %21 = vector.load %arg8[%c0_16, %c0_17] : memref<8x128xf32, #tpu.memory_space<vmem>>, vector<8x128xf32>
      %c0_18 = arith.constant 0 : index
      %c0_19 = arith.constant 0 : index
      %22 = vector.load %arg6[%c0_18, %c0_19] : memref<1x128xf32, #tpu.memory_space<vmem>>, vector<1x128xf32>
      %23 = vector.broadcast %22 : vector<1x128xf32> to vector<8x128xf32>
      %24 = arith.addf %21, %23 : vector<8x128xf32>
      %c0_20 = arith.constant 0 : index
      %c0_21 = arith.constant 0 : index
      %25 = vector.load %arg7[%c0_20, %c0_21] : memref<8x128xf32, #tpu.memory_space<vmem>>, vector<8x128xf32>
      tpu.vector_store %arg7[%c0_20, %c0_21], %24 {strides = array<i32>} : memref<8x128xf32, #tpu.memory_space<vmem>>, vector<8x128xf32>,
    } else {
    }
    return
  }
  func.func @transform_0(%arg0: i32, %arg1: i32) -> (i32, i32) {
    %c0_i32 = arith.constant 0 : i32
    %c0_i32_0 = arith.constant 0 : i32
    return %arg0, %c0_i32 : i32, i32
  }
  func.func @transform_1(%arg0: i32, %arg1: i32) -> (i32, i32) {
    %c0_i32 = arith.constant 0 : i32
    %c0_i32_0 = arith.constant 0 : i32
    return %c0_i32, %arg1 : i32, i32
  }
  func.func @transform_2(%arg0: i32, %arg1: i32) -> (i32, i32) {
    %c0_i32 = arith.constant 0 : i32
    %c0_i32_0 = arith.constant 0 : i32
    return %c0_i32, %arg1 : i32, i32
  }
  func.func @transform_3(%arg0: i32, %arg1: i32) -> (i32, i32) {
    %c0_i32 = arith.constant 0 : i32
    %c0_i32_0 = arith.constant 0 : i32
    return %arg1, %c0_i32 : i32, i32
  }
  func.func @transform_4(%arg0: i32, %arg1: i32) -> (i32, i32) {
    %c0_i32 = arith.constant 0 : i32
    %c0_i32_0 = arith.constant 0 : i32
    %c0_i32_1 = arith.constant 0 : i32
    return %c0_i32, %c0_i32_0 : i32, i32
  }
  func.func @transform_5(%arg0: i32, %arg1: i32) -> (i32, i32) {
    %c0_i32 = arith.constant 0 : i32
    %c0_i32_0 = arith.constant 0 : i32
    return %arg0, %c0_i32 : i32, i32
  }
}

</mosaic_0001>

<bundles_post_ra>
// kernel: tpu_custom_call.1
= control target key start
LH: loop header
LB: loop body
LE: loop exit
PB: predicated region body
PF: predicated region fallthrough
CT: control target
= control target key end

     0   :  { %10 = vsyncpa [#allocation4], 0  ;;  %s489_s0 = inlined_call_operand.hbm [shape: f32[8,32], index: 0, kind: input, shape index: {}]   ;;  %s490_s1 = inlined_call_operand.hbm [shape: bf16[32,64], index: 1, kind: input, shape index: {}]   ;;  %s491_s2 = inlined_call_operand.vmem [shape: f32[1,64], index: 2, kind: input, shape index: {}]   ;;  %s492_s3 = inlined_call_operand.hbm [shape: bf16[64,128], index: 3, kind: input, shape index: {}]   ;;  %s493_s4 = inlined_call_operand.vmem [shape: f32[1,128], index: 4, kind: input, shape index: {}]   ;;  %s494_s5 = inlined_call_operand.hbm [shape: f32[8,128], index: 5, kind: output, shape index: {}]  }
   0x1   :  { %11 = vsyncpa [#allocation7], 0 }
   0x2   :  { %12 = vsyncpa [#allocation5], 0  ;;  %s391_s18 = smov [#allocation6]   ;;  %s297_s22 = scalar_lea.hbm %s490_s1, 256 }
   0x3   :  { %s28_s19 = sshll.u32 %s391_s18, 4  ;;  %p298_p0 = scmp.ne.s32.totalorder %s490_s1, %s297_s22  ;;  %s29_s19 = int_to_ptr.vmem [resolvable:$true] %s28_s19 }
   0x4   :  { %p301_p1 = scmp.lt.u32.totalorder %s297_s22, %s490_s1 }
   0x6   :  { %p303_p2 = pnand %p301_p1, %p298_p0 }
   0x8   :  { %306 = shalt.err (!%p303_p2)
}
   0x9   :  { %s307_s27 = scalar_lea.vmem %s29_s19, 256  ;;  %p312_p4 = scmp.lt.s32.totalorder %s29_s19, %s29_s19 }
   0xa   :  { %p308_p3 = scmp.ne.s32.totalorder %s29_s19, %s307_s27  ;;  %p313_p5 = scmp.lt.s32.totalorder %s307_s27, %s307_s27 }
   0xc   :  { %p314_p6 = por %p313_p5, %p312_p4 }
   0xe   :  { %p315_p7 = pnand %p314_p6, %p308_p3 }
  0x10   :  { %318 = shalt.err (!%p315_p7)
}
  0x11   :  { %s392_s28 = smov 64   ;;  %s393_s29 = smov 4  }
  0x12   :  { %34 = dma.hbm_to_vmem [thread:$0]  %s490_s1, 256, %s29_s19, [#allocation7], %s392_s28, %s392_s28, %s393_s29  }
  0x13   :  { %s394_s7 = smov [#allocation3]   ;;  %s395_s9 = smov [#allocation8]  }
  0x14   :  { %s19_s8 = sshll.u32 %s394_s7, 4  ;;  %s42_s10 = sshll.u32 %s395_s9, 4  ;;  %s20_s8 = int_to_ptr.vmem [resolvable:$true] %s19_s8  ;;  %s43_s10 = int_to_ptr.vmem [resolvable:$true] %s42_s10 }
  0x15   :  { %s319_s13 = scalar_lea.hbm %s489_s0, 128 }
  0x16   :  { %p320_p8 = scmp.ne.s32.totalorder %s489_s0, %s319_s13  ;;  %p323_p9 = scmp.lt.u32.totalorder %s319_s13, %s489_s0 }
  0x18   :  { %p325_p10 = pnand %p323_p9, %p320_p8 }
  0x1a   :  { %328 = shalt.err (!%p325_p10)
}
  0x1b   :  { %s329_s1 = scalar_lea.vmem %s20_s8, 128  ;;  %p334_p12 = scmp.lt.s32.totalorder %s20_s8, %s20_s8 }
  0x1c   :  { %p330_p11 = scmp.ne.s32.totalorder %s20_s8, %s329_s1  ;;  %p335_p13 = scmp.lt.s32.totalorder %s329_s1, %s329_s1 }
  0x1e   :  { %p336_p0 = por %p335_p13, %p334_p12 }
  0x20   :  { %p337_p1 = pnand %p336_p0, %p330_p11 }
  0x22   :  { %340 = shalt.err (!%p337_p1)
}
  0x23   :  { %22 = dma.hbm_to_vmem [thread:$0]  %s489_s0, 128, %s20_s8, [#allocation4]  }
  0x24   :  { %s341_s22 = scalar_lea.hbm %s492_s3, 512 }
  0x25   :  { %p342_p2 = scmp.ne.s32.totalorder %s492_s3, %s341_s22  ;;  %p345_p3 = scmp.lt.u32.totalorder %s341_s22, %s492_s3 }
  0x27   :  { %p347_p4 = pnand %p345_p3, %p342_p2 }
  0x29   :  { %350 = shalt.err (!%p347_p4)
}
  0x2a   :  { %s351_s27 = scalar_lea.vmem %s43_s10, 512  ;;  %p356_p6 = scmp.lt.s32.totalorder %s43_s10, %s43_s10 }
  0x2b   :  { %p352_p5 = scmp.ne.s32.totalorder %s43_s10, %s351_s27  ;;  %p357_p7 = scmp.lt.s32.totalorder %s351_s27, %s351_s27 }
  0x2d   :  { %p358_p8 = por %p357_p7, %p356_p6 }
  0x2f   :  { %p359_p9 = pnand %p358_p8, %p352_p5 }
  0x31   :  { %362 = shalt.err (!%p359_p9)
}
  0x32   :  { %48 = dma.hbm_to_vmem [thread:$0]  %s492_s3, 512, %s43_s10, [#allocation7], %s392_s28, %s392_s28, %s393_s29  }
  0x33   :  { %385 = dma.done.wait [#allocation4], 128  }
  0x34   :  { %386 = vsyncadd [#allocation4], 4294967168 }
  0x35   :  { %387 = dma.done.wait [#allocation7], 768  }
  0x36   :  { %388 = vsyncadd [#allocation7], 4294966528  ;;  %v396_v0 = vmov 0.0   ;;  %vm397_vm0 = vmmov 0   ;;  %v291_v1 = vld [vmem:[#allocation6] sm:$0xff]   ;;  %v292_v2 = vld [vmem:[#allocation6 + $0x8] sm:$0xff]  }
  0x37   :  { %263 = vmatprep.subr.bf16.mxu0 %v396_v0  ;;  %267 = vmatprep.mubr.msk.bf16.mxu0 %vm397_vm0, %v396_v0  ;;  %v66_v3 = vld [vmem:[#allocation3] sm:$0xff]  ;;  %v293_v4 = vld [vmem:[#allocation8] sm:$0xff]   ;;  %vm91_vm1 = vcmask 261120   ;;  %v295_v7 = vld [vmem:[#allocation8 + $0x10] sm:$0xff]   ;;  %vm170_vm2 = vcmask 523264   ;;  %s398_s7 = smov [#allocation9]  }
  0x38   :  { %271 = vmatprep.subr.bf16.mxu1 %v396_v0  ;;  %279 = vmatprep.mubr.msk.bf16.mxu1 %vm397_vm0, %v396_v0  ;;  %v294_v5 = vld [vmem:[#allocation8 + $0x8] sm:$0xff]   ;;  %v67_v6 = vpack.c.bf16 %v66_v3, %v66_v3  ;;  %v296_v8 = vld [vmem:[#allocation8 + $0x18] sm:$0xff]   ;;  %s235_s8 = sshll.u32 %s398_s7, 4  ;;  %s236_s8 = int_to_ptr.vmem [resolvable:$true] %s235_s8 }
  0x39   :  { %264 = vmatpush3.bf16.msra.mxu0 %v291_v1  ;;  %272 = vmatpush3.bf16.msra.mxu1 %v293_v4  ;;  %v245_v9 = vld [vmem:[%s491_s2] ss:$0 sm:$0xff]  ;;  %s363_s2 = scalar_lea.vmem %s236_s8, 128  ;;  %p368_p11 = scmp.lt.s32.totalorder %s236_s8, %s236_s8 }
  0x3a   :  { %265 = vmatprep.subr.bf16.mxu0 %v396_v0  ;;  %273 = vmatprep.subr.bf16.mxu1 %v396_v0  ;;  %v254_v17 = vld [vmem:[%s493_s4] ss:$0 sm:$0xff]  ;;  %p364_p10 = scmp.ne.s32.totalorder %s236_s8, %s363_s2  ;;  %p369_p12 = scmp.lt.s32.totalorder %s363_s2, %s363_s2 }
  0x3c   :  { %p370_p13 = por %p369_p12, %p368_p11 }
  0x3d   :  { %266 = vmatpush3.bf16.msra.mxu0 %v292_v2  ;;  %274 = vmatpush3.bf16.msra.mxu1 %v294_v5 }
  0x3e   :  { %275 = vmatprep.subr.bf16.mxu1 %v396_v0  ;;  %p371_p0 = pnand %p370_p13, %p364_p10 }
  0x40   :  { %268 = vmatmul.mubr.msk.bf16.vlgmr.msra.gmra.mrb[0].mxu0 %vm91_vm1, %v67_v6 }
  0x41   :  { %276 = vmatpush3.bf16.msra.mxu1 %v295_v7 }
  0x42   :  { %277 = vmatprep.subr.bf16.mxu1 %v396_v0 }
  0x45   :  { %278 = vmatpush3.bf16.msra.mxu1 %v296_v8 }
 0x113   :  { %v129_v10 = vpop.f32.mrb[0].mxu0 }
 0x114   :  { %v130_v11 = vadd.f32 %v245_v9, %v129_v10  ;;  %v269_v12 = vpop.f32.mrb[1].mxu0 }
 0x115   :  { %v132_v13 = vpop.f32.mrb[2].mxu0 }
 0x116   :  { %v135_v14 = vmax.f32 %v130_v11, 0.0  ;;  %v270_v15 = vpop.f32.mrb[3].mxu0 }
 0x118   :  { %v136_v16 = vpack.c.bf16 %v135_v14, %v135_v14 }
 0x11a   :  { %280 = vmatmul.mubr.msk.bf16.vlgmr.msra.gmra.mrb[0].mxu1 %vm170_vm2, %v136_v16 }
 0x1ed   :  { %v208_v18 = vpop.f32.mrb[0].mxu1 }
 0x1ee   :  { %v227_v19 = vadd.f32 %v254_v17, %v208_v18  ;;  %v281_v20 = vpop.f32.mrb[1].mxu1 }
 0x1ef   :  { %v211_v21 = vpop.f32.mrb[2].mxu1 }
 0x1f0   :  { %228 = vst [vmem:[#allocation9] sm:$0xff] %v227_v19  ;;  %v282_v22 = vpop.f32.mrb[3].mxu1 }
 0x1f1   :  { %374 = shalt.err (!%p371_p0)
}
 0x1f2   :  { %s375_s4 = scalar_lea.hbm %s494_s5, 128 }
 0x1f3   :  { %p376_p1 = scmp.ne.s32.totalorder %s494_s5, %s375_s4  ;;  %p379_p2 = scmp.lt.u32.totalorder %s375_s4, %s494_s5 }
 0x1f5   :  { %p381_p3 = pnand %p379_p2, %p376_p1 }
 0x1f7   :  { %384 = shalt.err (!%p381_p3)
}
 0x1f8   :  { %238 = dma.vmem_to_hbm [thread:$0]  %s236_s8, 128, %s494_s5, [#allocation5]  }
 0x1f9   :  { %389 = dma.done.wait [#allocation5], 128  }
 0x1fa   :  { %390 = vsyncadd [#allocation5], 4294967168 }
 0x1fb   :  { %242 = vsyncpa [#allocation4], 1 }
 0x1fc   :  { %243 = vsyncpa [#allocation7], 1 }
 0x1fd   :  { %244 = vsyncpa [#allocation5], 1 }

// kernel: tpu_custom_call.1
= control target key start
LH: loop header
LB: loop body
LE: loop exit
PB: predicated region body
PF: predicated region fallthrough
CT: control target
= control target key end

     0   :  { %10 = vsyncpa [#allocation4], 0  ;;  %s489_s0 = inlined_call_operand.hbm [shape: f32[8,32], index: 0, kind: input, shape index: {}]   ;;  %s490_s1 = inlined_call_operand.hbm [shape: bf16[32,64], index: 1, kind: input, shape index: {}]   ;;  %s491_s2 = inlined_call_operand.vmem [shape: f32[1,64], index: 2, kind: input, shape index: {}]   ;;  %s492_s3 = inlined_call_operand.hbm [shape: bf16[64,128], index: 3, kind: input, shape index: {}]   ;;  %s493_s4 = inlined_call_operand.vmem [shape: f32[1,128], index: 4, kind: input, shape index: {}]   ;;  %s494_s5 = inlined_call_operand.hbm [shape: f32[8,128], index: 5, kind: output, shape index: {}]  }
   0x1   :  { %11 = vsyncpa [#allocation7], 0 }
   0x2   :  { %12 = vsyncpa [#allocation5], 0  ;;  %s391_s18 = smov [#allocation6]   ;;  %s297_s22 = scalar_lea.hbm %s490_s1, 256 }
   0x3   :  { %s28_s19 = sshll.u32 %s391_s18, 4  ;;  %p298_p0 = scmp.ne.s32.totalorder %s490_s1, %s297_s22  ;;  %s29_s19 = int_to_ptr.vmem [resolvable:$true] %s28_s19 }
   0x4   :  { %p301_p1 = scmp.lt.u32.totalorder %s297_s22, %s490_s1 }
   0x6   :  { %p303_p2 = pnand %p301_p1, %p298_p0 }
   0x8   :  { %306 = shalt.err (!%p303_p2)
}
   0x9   :  { %s307_s27 = scalar_lea.vmem %s29_s19, 256  ;;  %p312_p4 = scmp.lt.s32.totalorder %s29_s19, %s29_s19 }
   0xa   :  { %p308_p3 = scmp.ne.s32.totalorder %s29_s19, %s307_s27  ;;  %p313_p5 = scmp.lt.s32.totalorder %s307_s27, %s307_s27 }
   0xc   :  { %p314_p6 = por %p313_p5, %p312_p4 }
   0xe   :  { %p315_p7 = pnand %p314_p6, %p308_p3 }
  0x10   :  { %318 = shalt.err (!%p315_p7)
}
  0x11   :  { %s392_s28 = smov 64   ;;  %s393_s29 = smov 4  }
  0x12   :  { %34 = dma.hbm_to_vmem [thread:$0]  %s490_s1, 256, %s29_s19, [#allocation7], %s392_s28, %s392_s28, %s393_s29  }
  0x13   :  { %s394_s7 = smov [#allocation3]   ;;  %s395_s9 = smov [#allocation8]  }
  0x14   :  { %s19_s8 = sshll.u32 %s394_s7, 4  ;;  %s42_s10 = sshll.u32 %s395_s9, 4  ;;  %s20_s8 = int_to_ptr.vmem [resolvable:$true] %s19_s8  ;;  %s43_s10 = int_to_ptr.vmem [resolvable:$true] %s42_s10 }
  0x15   :  { %s319_s13 = scalar_lea.hbm %s489_s0, 128 }
  0x16   :  { %p320_p8 = scmp.ne.s32.totalorder %s489_s0, %s319_s13  ;;  %p323_p9 = scmp.lt.u32.totalorder %s319_s13, %s489_s0 }
  0x18   :  { %p325_p10 = pnand %p323_p9, %p320_p8 }
  0x1a   :  { %328 = shalt.err (!%p325_p10)
}
  0x1b   :  { %s329_s1 = scalar_lea.vmem %s20_s8, 128  ;;  %p334_p12 = scmp.lt.s32.totalorder %s20_s8, %s20_s8 }
  0x1c   :  { %p330_p11 = scmp.ne.s32.totalorder %s20_s8, %s329_s1  ;;  %p335_p13 = scmp.lt.s32.totalorder %s329_s1, %s329_s1 }
  0x1e   :  { %p336_p0 = por %p335_p13, %p334_p12 }
  0x20   :  { %p337_p1 = pnand %p336_p0, %p330_p11 }
  0x22   :  { %340 = shalt.err (!%p337_p1)
}
  0x23   :  { %22 = dma.hbm_to_vmem [thread:$0]  %s489_s0, 128, %s20_s8, [#allocation4]  }
  0x24   :  { %s341_s22 = scalar_lea.hbm %s492_s3, 512 }
  0x25   :  { %p342_p2 = scmp.ne.s32.totalorder %s492_s3, %s341_s22  ;;  %p345_p3 = scmp.lt.u32.totalorder %s341_s22, %s492_s3 }
  0x27   :  { %p347_p4 = pnand %p345_p3, %p342_p2 }
  0x29   :  { %350 = shalt.err (!%p347_p4)
}
  0x2a   :  { %s351_s27 = scalar_lea.vmem %s43_s10, 512  ;;  %p356_p6 = scmp.lt.s32.totalorder %s43_s10, %s43_s10 }
  0x2b   :  { %p352_p5 = scmp.ne.s32.totalorder %s43_s10, %s351_s27  ;;  %p357_p7 = scmp.lt.s32.totalorder %s351_s27, %s351_s27 }
  0x2d   :  { %p358_p8 = por %p357_p7, %p356_p6 }
  0x2f   :  { %p359_p9 = pnand %p358_p8, %p352_p5 }
  0x31   :  { %362 = shalt.err (!%p359_p9)
}
  0x32   :  { %48 = dma.hbm_to_vmem [thread:$0]  %s492_s3, 512, %s43_s10, [#allocation7], %s392_s28, %s392_s28, %s393_s29  }
  0x33   :  { %385 = dma.done.wait [#allocation4], 128  }
  0x34   :  { %386 = vsyncadd [#allocation4], 4294967168 }
  0x35   :  { %387 = dma.done.wait [#allocation7], 768  }
  0x36   :  { %388 = vsyncadd [#allocation7], 4294966528  ;;  %v396_v0 = vmov 0.0   ;;  %vm397_vm0 = vmmov 0   ;;  %v291_v1 = vld [vmem:[#allocation6] sm:$0xff]   ;;  %v292_v2 = vld [vmem:[#allocation6 + $0x8] sm:$0xff]  }
  0x37   :  { %263 = vmatprep.subr.bf16.mxu0 %v396_v0  ;;  %267 = vmatprep.mubr.msk.bf16.mxu0 %vm397_vm0, %v396_v0  ;;  %v66_v3 = vld [vmem:[#allocation3] sm:$0xff]  ;;  %v293_v4 = vld [vmem:[#allocation8] sm:$0xff]   ;;  %vm91_vm1 = vcmask 261120   ;;  %v295_v7 = vld [vmem:[#allocation8 + $0x10] sm:$0xff]   ;;  %vm170_vm2 = vcmask 523264   ;;  %s398_s7 = smov [#allocation9]  }
  0x38   :  { %271 = vmatprep.subr.bf16.mxu1 %v396_v0  ;;  %279 = vmatprep.mubr.msk.bf16.mxu1 %vm397_vm0, %v396_v0  ;;  %v294_v5 = vld [vmem:[#allocation8 + $0x8] sm:$0xff]   ;;  %v67_v6 = vpack.c.bf16 %v66_v3, %v66_v3  ;;  %v296_v8 = vld [vmem:[#allocation8 + $0x18] sm:$0xff]   ;;  %s235_s8 = sshll.u32 %s398_s7, 4  ;;  %s236_s8 = int_to_ptr.vmem [resolvable:$true] %s235_s8 }
  0x39   :  { %264 = vmatpush3.bf16.msra.mxu0 %v291_v1  ;;  %272 = vmatpush3.bf16.msra.mxu1 %v293_v4  ;;  %v245_v9 = vld [vmem:[%s491_s2] ss:$0 sm:$0xff]  ;;  %s363_s2 = scalar_lea.vmem %s236_s8, 128  ;;  %p368_p11 = scmp.lt.s32.totalorder %s236_s8, %s236_s8 }
  0x3a   :  { %265 = vmatprep.subr.bf16.mxu0 %v396_v0  ;;  %273 = vmatprep.subr.bf16.mxu1 %v396_v0  ;;  %v254_v17 = vld [vmem:[%s493_s4] ss:$0 sm:$0xff]  ;;  %p364_p10 = scmp.ne.s32.totalorder %s236_s8, %s363_s2  ;;  %p369_p12 = scmp.lt.s32.totalorder %s363_s2, %s363_s2 }
  0x3c   :  { %p370_p13 = por %p369_p12, %p368_p11 }
  0x3d   :  { %266 = vmatpush3.bf16.msra.mxu0 %v292_v2  ;;  %274 = vmatpush3.bf16.msra.mxu1 %v294_v5 }
  0x3e   :  { %275 = vmatprep.subr.bf16.mxu1 %v396_v0  ;;  %p371_p0 = pnand %p370_p13, %p364_p10 }
  0x40   :  { %268 = vmatmul.mubr.msk.bf16.vlgmr.msra.gmra.mrb[0].mxu0 %vm91_vm1, %v67_v6 }
  0x41   :  { %276 = vmatpush3.bf16.msra.mxu1 %v295_v7 }
  0x42   :  { %277 = vmatprep.subr.bf16.mxu1 %v396_v0 }
  0x45   :  { %278 = vmatpush3.bf16.msra.mxu1 %v296_v8 }
 0x113   :  { %v129_v10 = vpop.f32.mrb[0].mxu0 }
 0x114   :  { %v130_v11 = vadd.f32 %v245_v9, %v129_v10  ;;  %v269_v12 = vpop.f32.mrb[1].mxu0 }
 0x115   :  { %v132_v13 = vpop.f32.mrb[2].mxu0 }
 0x116   :  { %v135_v14 = vmax.f32 %v130_v11, 0.0  ;;  %v270_v15 = vpop.f32.mrb[3].mxu0 }
 0x118   :  { %v136_v16 = vpack.c.bf16 %v135_v14, %v135_v14 }
 0x11a   :  { %280 = vmatmul.mubr.msk.bf16.vlgmr.msra.gmra.mrb[0].mxu1 %vm170_vm2, %v136_v16 }
 0x1ed   :  { %v208_v18 = vpop.f32.mrb[0].mxu1 }
 0x1ee   :  { %v227_v19 = vadd.f32 %v254_v17, %v208_v18  ;;  %v281_v20 = vpop.f32.mrb[1].mxu1 }
 0x1ef   :  { %v211_v21 = vpop.f32.mrb[2].mxu1 }
 0x1f0   :  { %228 = vst [vmem:[#allocation9] sm:$0xff] %v227_v19  ;;  %v282_v22 = vpop.f32.mrb[3].mxu1 }
 0x1f1   :  { %374 = shalt.err (!%p371_p0)
}
 0x1f2   :  { %s375_s4 = scalar_lea.hbm %s494_s5, 128 }
 0x1f3   :  { %p376_p1 = scmp.ne.s32.totalorder %s494_s5, %s375_s4  ;;  %p379_p2 = scmp.lt.u32.totalorder %s375_s4, %s494_s5 }
 0x1f5   :  { %p381_p3 = pnand %p379_p2, %p376_p1 }
 0x1f7   :  { %384 = shalt.err (!%p381_p3)
}
 0x1f8   :  { %238 = dma.vmem_to_hbm [thread:$0]  %s236_s8, 128, %s494_s5, [#allocation5]  }
 0x1f9   :  { %389 = dma.done.wait [#allocation5], 128  }
 0x1fa   :  { %390 = vsyncadd [#allocation5], 4294967168 }
 0x1fb   :  { %242 = vsyncpa [#allocation4], 1 }
 0x1fc   :  { %243 = vsyncpa [#allocation7], 1 }
 0x1fd   :  { %244 = vsyncpa [#allocation5], 1 }

</bundles_post_ra>
